<compile_context>
chip_gen: v5e
topology: v5e:2x2
jax: 0.10.0
libtpu: 0.0.40
codegen_flags: <defaults>
</compile_context>

<pallas_src>
import functools

import jax
import jax.numpy as jnp
from jax.experimental import pallas as pl
from jax.experimental.pallas import tpu as pltpu

LANES = 128


def _sublane_multiple(*dtypes):
    # Second-to-last block dim should respect sublane packing of the
    # narrowest participating dtype (f32 -> 8, bf16 -> 16, 8-bit -> 32).
    m = 8
    for d in dtypes:
        its = jnp.dtype(d).itemsize
        m = max(m, 8 * max(1, 4 // its))
    return m


def _sq_loss_kernel(yp_ref, y_ref, o_ref, acc_ref, *, rows, block_rows, mask_rows):
    i = pl.program_id(0)

    @pl.when(i == 0)
    def _():
        acc_ref[...] = jnp.zeros_like(acc_ref)

    # Cast in-kernel (inputs arrive in their native dtype).
    d = yp_ref[...].astype(jnp.float32) - y_ref[...].astype(jnp.float32)
    sq = d * d

    if mask_rows:
        # Last grid block may extend past the array; out-of-bounds rows hold
        # unspecified data, so zero them before accumulating.
        row_id = i * block_rows + jax.lax.broadcasted_iota(
            jnp.int32, (block_rows, LANES), 0
        )
        sq = jnp.where(row_id < rows, sq, 0.0)

    # Element-wise accumulation only (VPU); no per-step cross-lane reduce.
    acc_ref[...] += sq

    @pl.when(i == pl.num_programs(0) - 1)
    def _():
        o_ref[...] = jnp.sqrt(jnp.sum(acc_ref[...], keepdims=True)).astype(o_ref.dtype)


@functools.partial(jax.jit, static_argnames=("row_tile",))
def square_loss(ypred, y, *, row_tile=2048):
    assert ypred.shape == y.shape, "ypred and y must have the same shape"

    n = int(ypred.size)
    if n == 0:
        return jnp.float32(0.0)

    yp_flat = jnp.ravel(ypred)
    y_flat = jnp.ravel(y)

    # Lane-dense [rows, 128] view.  Free reshape when n is a multiple of 128;
    # otherwise zero-pad only the tail (zeros contribute 0 to the loss).
    if n % LANES == 0:
        rows = n // LANES
        yp2d = yp_flat.reshape(rows, LANES)
        y2d = y_flat.reshape(rows, LANES)
    else:
        pad = LANES - (n % LANES)
        rows = (n + pad) // LANES
        yp2d = jnp.pad(yp_flat, (0, pad)).reshape(rows, LANES)
        y2d = jnp.pad(y_flat, (0, pad)).reshape(rows, LANES)

    sub = _sublane_multiple(ypred.dtype, y.dtype)
    row_tile = max(sub, (int(row_tile) // sub) * sub)

    if rows <= row_tile:
        # Single block covering the full row extent (always a legal block shape).
        block_rows = rows
        grid_rows = 1
        mask_rows = False
    else:
        block_rows = row_tile
        grid_rows = pl.cdiv(rows, row_tile)
        mask_rows = (rows % row_tile) != 0

    kernel = functools.partial(
        _sq_loss_kernel, rows=rows, block_rows=block_rows, mask_rows=mask_rows
    )

    out = pl.pallas_call(
        kernel,
        out_shape=jax.ShapeDtypeStruct((1, 1), jnp.float32),
        grid_spec=pltpu.PrefetchScalarGridSpec(
            num_scalar_prefetch=0,
            grid=(grid_rows,),
            in_specs=[
                pl.BlockSpec((block_rows, LANES), lambda i: (i, 0)),
                pl.BlockSpec((block_rows, LANES), lambda i: (i, 0)),
            ],
            out_specs=pl.BlockSpec((1, 1), lambda i: (0, 0)),
            scratch_shapes=[pltpu.VMEM((block_rows, LANES), jnp.float32)],
        ),
        compiler_params=pltpu.CompilerParams(
            dimension_semantics=("arbitrary",),
        ),
    )(yp2d, y2d)

    return out[0, 0]


if __name__ == "__main__":
    key = jax.random.PRNGKey(0)
    k1, k2, k3, k4, k5, k6 = jax.random.split(key, 6)

    # Case 1: module-like small shape (fast path: free reshape, single grid step).
    shape = (2, 4, 16, 16)
    ypred = jax.random.normal(k1, shape, dtype=jnp.float32)
    y = jax.random.normal(k2, shape, dtype=jnp.float32)
    loss = jax.block_until_ready(square_loss(ypred, y))
    ref = jnp.sqrt(jnp.sum((ypred - y) ** 2))
    assert jnp.allclose(loss, ref, rtol=1e-5, atol=1e-5), (loss, ref)

    # Case 2: ragged size -> tail pad + in-kernel row mask, multi-step grid.
    yp2 = jax.random.normal(k3, (7, 333), dtype=jnp.float32)
    y2 = jax.random.normal(k4, (7, 333), dtype=jnp.float32)
    loss2 = jax.block_until_ready(square_loss(yp2, y2, row_tile=8))
    ref2 = jnp.sqrt(jnp.sum((yp2 - y2) ** 2))
    assert jnp.allclose(loss2, ref2, rtol=1e-5, atol=1e-5), (loss2, ref2)

    # Case 3: bf16 inputs stay bf16 on the wire; f32 accumulation in-kernel.
    yp3 = jax.random.normal(k5, (64, 256), dtype=jnp.bfloat16)
    y3 = jax.random.normal(k6, (64, 256), dtype=jnp.bfloat16)
    loss3 = jax.block_until_ready(square_loss(yp3, y3))
    ref3 = jnp.sqrt(
        jnp.sum((yp3.astype(jnp.float32) - y3.astype(jnp.float32)) ** 2)
    )
    assert jnp.allclose(loss3, ref3, rtol=1e-4, atol=1e-4), (loss3, ref3)

    print("KERNEL_OK")
</pallas_src>

<mosaic_0001>
module attributes {stable_mosaic.version = 11 : i64} {
  func.func @_sq_loss_kernel(%arg0: i32, %arg1: memref<16x128xf32, #tpu.memory_space<vmem>>, %arg2: memref<16x128xf32, #tpu.memory_space<vmem>>, %arg3: memref<1x1xf32, #tpu.memory_space<vmem>>, %arg4: memref<16x128xf32, #tpu.memory_space<vmem>>) attributes {dimension_semantics = [#tpu.dimension_semantics<arbitrary>], iteration_bounds = array<i64: 1>, scalar_prefetch = 0 : i64, scratch_operands = 1 : i64, tpu.core_type = #tpu.core_type<tc>, window_params = [{transform_indices = @transform_0, window_bounds = array<i64: 16, 128>}, {transform_indices = @transform_1, window_bounds = array<i64: 16, 128>}, {pipeline_mode = #tpu.pipeline_mode<synchronous>, transform_indices = @transform_2, window_bounds = array<i64: 1, 1>}]} {
    %c0_i32 = arith.constant 0 : i32
    %0 = arith.cmpi eq, %arg0, %c0_i32 : i32
    %1 = arith.extui %0 : i1 to i32
    %c0_i32_0 = arith.constant 0 : i32
    %2 = arith.cmpi ne, %1, %c0_i32_0 : i32
    scf.if %2 {
      %cst = arith.constant 0.000000e+00 : f32
      %13 = vector.broadcast %cst : f32 to vector<16x128xf32>
      %c0_10 = arith.constant 0 : index
      %c0_11 = arith.constant 0 : index
      %14 = vector.load %arg4[%c0_10, %c0_11] : memref<16x128xf32, #tpu.memory_space<vmem>>, vector<16x128xf32>
      tpu.vector_store %arg4[%c0_10, %c0_11], %13 {strides = array<i32>} : memref<16x128xf32, #tpu.memory_space<vmem>>, vector<16x128xf32>,
    } else {
    }
    %c0 = arith.constant 0 : index
    %c0_1 = arith.constant 0 : index
    %3 = vector.load %arg1[%c0, %c0_1] : memref<16x128xf32, #tpu.memory_space<vmem>>, vector<16x128xf32>
    %c0_2 = arith.constant 0 : index
    %c0_3 = arith.constant 0 : index
    %4 = vector.load %arg2[%c0_2, %c0_3] : memref<16x128xf32, #tpu.memory_space<vmem>>, vector<16x128xf32>
    %5 = arith.subf %3, %4 : vector<16x128xf32>
    %6 = arith.mulf %5, %5 : vector<16x128xf32>
    %c0_4 = arith.constant 0 : index
    %c0_5 = arith.constant 0 : index
    %7 = vector.load %arg4[%c0_4, %c0_5] : memref<16x128xf32, #tpu.memory_space<vmem>>, vector<16x128xf32>
    %8 = arith.addf %7, %6 : vector<16x128xf32>
    %c0_6 = arith.constant 0 : index
    %c0_7 = arith.constant 0 : index
    %9 = vector.load %arg4[%c0_6, %c0_7] : memref<16x128xf32, #tpu.memory_space<vmem>>, vector<16x128xf32>
    tpu.vector_store %arg4[%c0_6, %c0_7], %8 {strides = array<i32>} : memref<16x128xf32, #tpu.memory_space<vmem>>, vector<16x128xf32>,
    %c0_i32_8 = arith.constant 0 : i32
    %10 = arith.cmpi eq, %arg0, %c0_i32_8 : i32
    %11 = arith.extui %10 : i1 to i32
    %c0_i32_9 = arith.constant 0 : i32
    %12 = arith.cmpi ne, %11, %c0_i32_9 : i32
    scf.if %12 {
      %c0_10 = arith.constant 0 : index
      %c0_11 = arith.constant 0 : index
      %13 = vector.load %arg4[%c0_10, %c0_11] : memref<16x128xf32, #tpu.memory_space<vmem>>, vector<16x128xf32>
      %14 = vector.shape_cast %13 : vector<16x128xf32> to vector<1x16x128xf32>
      %cst = arith.constant dense<0.000000e+00> : vector<1xf32>
      %15 = vector.multi_reduction <add>, %14, %cst [1, 2] : vector<1x16x128xf32> to vector<1xf32>
      %16 = vector.shape_cast %15 : vector<1xf32> to vector<1x1x1xf32>
      %17 = vector.extract %16[0, 0, 0] : f32 from vector<1x1x1xf32>
      %18 = vector.broadcast %17 : f32 to vector<1x1xf32>
      %19 = math.sqrt %18 : vector<1x1xf32>
      %c0_12 = arith.constant 0 : index
      %c0_13 = arith.constant 0 : index
      %20 = vector.load %arg3[%c0_12, %c0_13] : memref<1x1xf32, #tpu.memory_space<vmem>>, vector<1x1xf32>
      tpu.vector_store %arg3[%c0_12, %c0_13], %19 {strides = array<i32>} : memref<1x1xf32, #tpu.memory_space<vmem>>, vector<1x1xf32>,
    } else {
    }
    return
  }
  func.func @transform_0(%arg0: i32) -> (i32, i32) {
    %c0_i32 = arith.constant 0 : i32
    %c0_i32_0 = arith.constant 0 : i32
    return %arg0, %c0_i32 : i32, i32
  }
  func.func @transform_1(%arg0: i32) -> (i32, i32) {
    %c0_i32 = arith.constant 0 : i32
    %c0_i32_0 = arith.constant 0 : i32
    return %arg0, %c0_i32 : i32, i32
  }
  func.func @transform_2(%arg0: i32) -> (i32, i32) {
    %c0_i32 = arith.constant 0 : i32
    %c0_i32_0 = arith.constant 0 : i32
    %c0_i32_1 = arith.constant 0 : i32
    return %c0_i32, %c0_i32_0 : i32, i32
  }
}

</mosaic_0001>

<bundles_post_ra>
// kernel: square_loss.1
= control target key start
LH: loop header
LB: loop body
LE: loop exit
PB: predicated region body
PF: predicated region fallthrough
CT: control target
= control target key end

     0   :  { %s140_s0 = inlined_call_operand.vmem [shape: f32[16,128], index: 0, kind: input, shape index: {}]   ;;  %s141_s1 = inlined_call_operand.vmem [shape: f32[16,128], index: 1, kind: input, shape index: {}]   ;;  %s142_s2 = inlined_call_operand.hbm [shape: f32[1,1], index: 2, kind: output, shape index: {}]  }
   0x1   :  { %v18_v0 = vld [vmem:[%s140_s0] sm:$0xff]  ;;  %v19_v1 = vld [vmem:[%s140_s0 + $0x8] sm:$0xff] }
   0x2   :  { %v20_v2 = vld [vmem:[%s141_s1] sm:$0xff]  ;;  %v21_v3 = vld [vmem:[%s141_s1 + $0x8] sm:$0xff] }
   0x3   :  { %v22_v4 = vsub.f32 %v18_v0, %v20_v2 }
   0x4   :  { %7 = vsyncpa [#allocation4], 0  ;;  %v23_v5 = vsub.f32 %v19_v1, %v21_v3  ;;  %s109_s1 = smov [#allocation3]   ;;  %s69_s20 = sshll.u32 %s142_s2, 4  ;;  %vm60_vm1 = vcmask 0   ;;  %s70_s20 = int_to_ptr.hbm [resolvable:$true] %s69_s20 }
   0x5   :  { %v24_v6 = vmul.f32 %v22_v4, %v22_v4  ;;  %s67_s17 = sshll.u32 %s109_s1, 4  ;;  %s68_s17 = int_to_ptr.vmem [resolvable:$true] %s67_s17 }
   0x6   :  { %v25_v7 = vmul.f32 %v23_v5, %v23_v5 }
   0x8   :  { %v37_v8 = vadd.f32 %v25_v7, %v24_v6 }
   0xa   :  { %38 = vadd.xlane.f32.xlu0 %v37_v8 }
  0x7d   :  { %v39_v9 = vpop.xlane.xlu0 %38 }
  0x7e   :  { %v40_v10 = vrot.slane %v39_v9, 4 }
  0x80   :  { %v41_v11 = vadd.f32 %v40_v10, %v39_v9 }
  0x82   :  { %v42_v12 = vrot.slane %v41_v11, 2 }
  0x84   :  { %v43_v13 = vadd.f32 %v42_v12, %v41_v11 }
  0x86   :  { %v44_v14 = vrot.slane %v43_v13, 1 }
  0x88   :  { %v45_v15 = vadd.f32 %v44_v14, %v43_v13 }
  0x8a   :  { %78 = vpush %v45_v15 }
  0xbb   :  { %s79_s0 = spop %78 }
  0xbc   :  { %v47_v16 = vstv %s79_s0 }
  0xbd   :  { %81 = vrsqrt.f32 %v47_v16  ;;  %vm55_vm0 = vcmp.eq.f32.partialorder %v47_v16, inf  ;;  %v58_v24 = vand.u32 2147483648, %v47_v16  ;;  %vm57_vm2 = vcmp.eq.f32.partialorder %v47_v16, 0.0 }
  0xc3   :  { %v82_v17 = vpop.eup %81 }
  0xc4   :  { %v49_v18 = vmul.f32 %v82_v17, %v47_v16 }
  0xc6   :  { %v50_v19 = vmul.f32 %v82_v17, %v49_v18 }
  0xc8   :  { %v51_v20 = vmul.f32 0.5, %v50_v19 }
  0xca   :  { %v52_v21 = vsub.f32 1.5, %v51_v20 }
  0xcc   :  { %v53_v22 = vmul.f32 %v82_v17, %v52_v21 }
  0xce   :  { %v54_v23 = vmul.f32 %v53_v22, %v47_v16 }
  0xd0   :  { %v56_v25 = vsel %vm55_vm0, %v47_v16, %v54_v23 }
  0xd1   :  { %v59_v26 = vsel %vm57_vm2, %v58_v24, %v56_v25 }
  0xd2   :  { %61 = vst.msk [vmem:[#allocation3] sm:$0x1] %vm60_vm1, %v59_v26 }
  0xd3   :  { %72 = dma.vmem_to_hbm [thread:$0]  %s68_s17, 16, %s70_s20, [#allocation4]  }
  0xd4   :  { %107 = dma.done.wait [#allocation4], 16  }
  0xd5   :  { %108 = vsyncadd [#allocation4], 4294967280 }
  0xd6   :  { %77 = vsyncpa [#allocation4], 1 }

</bundles_post_ra>
